<compile_context>
chip_gen: v5e
topology: v5e:2x2
jax: 0.10.0
libtpu: 0.0.40
codegen_flags: <defaults>
</compile_context>

<pallas_src>
import functools
import math

import jax
import jax.numpy as jnp
from jax.experimental import pallas as pl
from jax.experimental.pallas import tpu as pltpu


def _sigmoid_attn_kernel(x_ref, wqk_ref, bqk_ref, z_ref, y_ref, *, scale, n_head):
    bt, T, C = x_ref.shape
    hd = C // n_head

    # Fused q/k projection: one wide MXU matmul (bt*T, C) @ (C, 2C), f32 accumulate.
    x2 = x_ref[...].reshape(bt * T, C)
    qk = (jnp.dot(x2, wqk_ref[...], preferred_element_type=jnp.float32)
          + bqk_ref[...])                       # (bt*T, 2C): [:, :C]=q, [:, C:]=k

    # Strictly-causal mask (j < i), built once per grid step.
    row = jax.lax.broadcasted_iota(jnp.int32, (T, T), 0)
    col = jax.lax.broadcasted_iota(jnp.int32, (T, T), 1)
    mask = (col < row).astype(jnp.float32)      # (T, T) strict lower triangle

    # Sum the masked sigmoid probabilities over heads (cheap VPU adds of (T, T)
    # tiles) before the single value matmul. The per-head score matmuls are
    # unavoidable (different contraction slices) but tiny; unrolled statically.
    p_sum = jnp.zeros((bt, T, T), dtype=jnp.float32)
    for h in range(n_head):
        qh = qk[:, h * hd:(h + 1) * hd].reshape(bt, T, hd)
        kh = qk[:, C + h * hd:C + (h + 1) * hd].reshape(bt, T, hd)
        s = jnp.einsum('btd,bsd->bts', qh, kh,
                       preferred_element_type=jnp.float32) * scale
        p_sum = p_sum + jax.nn.sigmoid(s) * mask[None, :, :]

    z = z_ref[...].astype(jnp.float32)          # (bt, T, Dz)
    # +eye(T) per head contributes n_head * z in total.
    y = (jnp.einsum('bts,bsd->btd', p_sum, z,
                    preferred_element_type=jnp.float32)
         + float(n_head) * z)
    y_ref[...] = y.astype(y_ref.dtype)


def sigmoid_attention(x, z, w_attn, b_attn, *, n_head):
    """Forward pass of SigmoidAttention as a single fused Pallas TPU kernel.

    x:      (B, T, C) activations
    z:      (B, T, Dz) value-like input (attended with the sigmoid weights)
    w_attn: (3C, C)  nn.Linear(C, 3C).weight
    b_attn: (3C,)    nn.Linear(C, 3C).bias
    """
    B, T, C = x.shape
    assert C % n_head == 0
    hd = C // n_head
    Dz = z.shape[-1]
    scale = 1.0 / math.sqrt(hd)
    out_dtype = jnp.result_type(x.dtype, z.dtype)

    # qkv = x @ W^T + b; only q and k influence the output (v is dead code).
    # Fuse the q and k projections into a single (C, 2C) weight + (1, 2C) bias.
    wqk = jnp.concatenate([w_attn[:C, :].T, w_attn[C:2 * C, :].T], axis=1)   # (C, 2C)
    bqk = jnp.concatenate([b_attn[:C], b_attn[C:2 * C]]).reshape(1, 2 * C)   # (1, 2C)

    # Batch tiling: aim for 2 grid steps so v7x's two TensorCores each take half
    # the batch (single-TC v5e/v6e pays one extra ~0.35us step, negligible).
    # Cap bt so very large B still fits comfortably in VMEM per step, and pad B
    # wrapper-side to a multiple of bt (never fall back to bt=1 / B serial steps).
    bt = min(pl.cdiv(B, 2), 256) if B > 1 else 1
    num_tiles = pl.cdiv(B, bt)
    B_pad = num_tiles * bt
    if B_pad != B:
        x = jnp.pad(x, ((0, B_pad - B), (0, 0), (0, 0)))
        z = jnp.pad(z, ((0, B_pad - B), (0, 0), (0, 0)))

    kernel = functools.partial(_sigmoid_attn_kernel, scale=scale, n_head=n_head)

    y = pl.pallas_call(
        kernel,
        out_shape=jax.ShapeDtypeStruct((B_pad, T, Dz), out_dtype),
        grid=(num_tiles,),
        in_specs=[
            pl.BlockSpec((bt, T, C), lambda b: (b, 0, 0)),       # x
            pl.BlockSpec((C, 2 * C), lambda b: (0, 0)),          # fused W_qk
            pl.BlockSpec((1, 2 * C), lambda b: (0, 0)),          # fused b_qk
            pl.BlockSpec((bt, T, Dz), lambda b: (b, 0, 0)),      # z
        ],
        out_specs=pl.BlockSpec((bt, T, Dz), lambda b: (b, 0, 0)),
        compiler_params=pltpu.CompilerParams(
            dimension_semantics=("parallel",)),
    )(x, wqk, bqq := bqk, z)  # noqa: F841 (walrus only to keep line short)
    return y[:B] if B_pad != B else y


def _reference(x, z, w_attn, b_attn, n_head):
    """Pure-JAX transcription of the PyTorch forward (for verification)."""
    B, T, C = x.shape
    hd = C // n_head
    qkv = x @ w_attn.T + b_attn
    q, k, _v = jnp.split(qkv, 3, axis=2)
    q = q.reshape(B, T, n_head, hd).transpose(0, 2, 1, 3)
    k = k.reshape(B, T, n_head, hd).transpose(0, 2, 1, 3)
    att = jnp.einsum('bhtd,bhsd->bhts', q, k) * (1.0 / math.sqrt(hd))
    mask = jnp.tril(jnp.ones((T, T), dtype=jnp.float32), k=-1)
    att = jnp.where(mask[None, None] == 0, -jnp.inf, att)
    att = jax.nn.sigmoid(att) + jnp.eye(T, dtype=jnp.float32)
    y = jnp.einsum('bhts,bsd->bhtd', att, z)
    return y.sum(axis=1)


if __name__ == "__main__":
    # Small shapes consistent with the module: B=2, T=16 (block_size), C=32, 4 heads.
    B, T, C = 2, 16, 32
    n_head = 4
    Dz = 32

    key = jax.random.PRNGKey(0)
    kx, kz, kw, kb = jax.random.split(key, 4)
    x = jax.random.normal(kx, (B, T, C), dtype=jnp.float32)
    z = jax.random.normal(kz, (B, T, Dz), dtype=jnp.float32)
    w_attn = 0.05 * jax.random.normal(kw, (3 * C, C), dtype=jnp.float32)
    b_attn = 0.02 * jax.random.normal(kb, (3 * C,), dtype=jnp.float32)

    y = sigmoid_attention(x, z, w_attn, b_attn, n_head=n_head)
    jax.block_until_ready(y)

    y_ref = _reference(x, z, w_attn, b_attn, n_head)
    assert y.shape == (B, T, Dz) and y.dtype == x.dtype
    max_err = float(jnp.max(jnp.abs(y - y_ref)))
    assert max_err < 1e-4, f"mismatch vs reference: {max_err}"

    print("KERNEL_OK")
</pallas_src>

<mosaic_0001>
module attributes {stable_mosaic.version = 11 : i64} {
  func.func @_sigmoid_attn_kernel(%arg0: i32, %arg1: memref<1x16x32xf32, #tpu.memory_space<vmem>>, %arg2: memref<32x64xf32, #tpu.memory_space<vmem>>, %arg3: memref<1x64xf32, #tpu.memory_space<vmem>>, %arg4: memref<1x16x32xf32, #tpu.memory_space<vmem>>, %arg5: memref<1x16x32xf32, #tpu.memory_space<vmem>>) attributes {dimension_semantics = [#tpu.dimension_semantics<parallel>], iteration_bounds = array<i64: 2>, scalar_prefetch = 0 : i64, scratch_operands = 0 : i64, tpu.core_type = #tpu.core_type<tc>, window_params = [{transform_indices = @transform_0, window_bounds = array<i64: 1, 16, 32>}, {pipeline_mode = #tpu.pipeline_mode<synchronous>, transform_indices = @transform_1, window_bounds = array<i64: 32, 64>}, {pipeline_mode = #tpu.pipeline_mode<synchronous>, transform_indices = @transform_2, window_bounds = array<i64: 1, 64>}, {transform_indices = @transform_3, window_bounds = array<i64: 1, 16, 32>}, {transform_indices = @transform_4, window_bounds = array<i64: 1, 16, 32>}]} {
    %c0 = arith.constant 0 : index
    %c0_0 = arith.constant 0 : index
    %c0_1 = arith.constant 0 : index
    %0 = vector.load %arg1[%c0, %c0_0, %c0_1] : memref<1x16x32xf32, #tpu.memory_space<vmem>>, vector<1x16x32xf32>
    %1 = vector.shape_cast %0 : vector<1x16x32xf32> to vector<16x32xf32>
    %c0_2 = arith.constant 0 : index
    %c0_3 = arith.constant 0 : index
    %2 = vector.load %arg2[%c0_2, %c0_3] : memref<32x64xf32, #tpu.memory_space<vmem>>, vector<32x64xf32>
    %cst = arith.constant dense<0.000000e+00> : vector<16x64xf32>
    %3 = tpu.matmul %1, %2, %cst {dimension_numbers = #tpu.dot_dimension_numbers<[1], [0], [0], [1], [0, 0, 1, 1], [], []>} : vector<16x32xf32>, vector<32x64xf32>, vector<16x64xf32> -> vector<16x64xf32>
    %c0_4 = arith.constant 0 : index
    %c0_5 = arith.constant 0 : index
    %4 = vector.load %arg3[%c0_4, %c0_5] : memref<1x64xf32, #tpu.memory_space<vmem>>, vector<1x64xf32>
    %5 = vector.broadcast %4 : vector<1x64xf32> to vector<16x64xf32>
    %6 = arith.addf %3, %5 : vector<16x64xf32>
    %7 = tpu.iota {dimensions = array<i32: 0>} : vector<16x16xi32>
    %8 = tpu.iota {dimensions = array<i32: 1>} : vector<16x16xi32>
    %9 = arith.cmpi slt, %8, %7 : vector<16x16xi32>
    %10 = arith.extui %9 : vector<16x16xi1> to vector<16x16xi32>
    %11 = arith.sitofp %10 : vector<16x16xi32> to vector<16x16xf32>
    %cst_6 = arith.constant 0.000000e+00 : f32
    %12 = vector.broadcast %cst_6 : f32 to vector<1x16x16xf32>
    %13 = vector.extract_strided_slice %6 {offsets = [0, 0], sizes = [16, 8], strides = [1, 1]} : vector<16x64xf32> to vector<16x8xf32>
    %14 = vector.shape_cast %13 : vector<16x8xf32> to vector<1x16x8xf32>
    %15 = vector.extract_strided_slice %6 {offsets = [0, 32], sizes = [16, 8], strides = [1, 1]} : vector<16x64xf32> to vector<16x8xf32>
    %16 = vector.shape_cast %15 : vector<16x8xf32> to vector<1x16x8xf32>
    "tpu.trace_start"() <{level = 10 : i32, message = "btd,bsd->bts"}> : () -> ()
    %cst_7 = arith.constant dense<0.000000e+00> : vector<1x16x16xf32>
    %17 = tpu.matmul %14, %16, %cst_7 {dimension_numbers = #tpu.dot_dimension_numbers<[2], [2], [1], [1], [0, 0, 0, 1, 1, 1], [0], [0]>} : vector<1x16x8xf32>, vector<1x16x8xf32>, vector<1x16x16xf32> -> vector<1x16x16xf32>
    "tpu.trace_stop"() : () -> ()
    %cst_8 = arith.constant 0.353553385 : f32
    %18 = vector.broadcast %cst_8 : f32 to vector<1x16x16xf32>
    %19 = arith.mulf %17, %18 : vector<1x16x16xf32>
    %20 = arith.negf %19 : vector<1x16x16xf32>
    %21 = math.exp %20 : vector<1x16x16xf32>
    %cst_9 = arith.constant 1.000000e+00 : f32
    %22 = vector.broadcast %cst_9 : f32 to vector<1x16x16xf32>
    %23 = arith.addf %22, %21 : vector<1x16x16xf32>
    %24 = arith.divf %22, %23 : vector<1x16x16xf32>
    %25 = vector.shape_cast %11 : vector<16x16xf32> to vector<1x16x16xf32>
    %26 = arith.mulf %24, %25 : vector<1x16x16xf32>
    %27 = arith.addf %12, %26 : vector<1x16x16xf32>
    %28 = vector.extract_strided_slice %6 {offsets = [0, 8], sizes = [16, 8], strides = [1, 1]} : vector<16x64xf32> to vector<16x8xf32>
    %29 = vector.shape_cast %28 : vector<16x8xf32> to vector<1x16x8xf32>
    %30 = vector.extract_strided_slice %6 {offsets = [0, 40], sizes = [16, 8], strides = [1, 1]} : vector<16x64xf32> to vector<16x8xf32>
    %31 = vector.shape_cast %30 : vector<16x8xf32> to vector<1x16x8xf32>
    "tpu.trace_start"() <{level = 10 : i32, message = "btd,bsd->bts"}> : () -> ()
    %cst_10 = arith.constant dense<0.000000e+00> : vector<1x16x16xf32>
    %32 = tpu.matmul %29, %31, %cst_10 {dimension_numbers = #tpu.dot_dimension_numbers<[2], [2], [1], [1], [0, 0, 0, 1, 1, 1], [0], [0]>} : vector<1x16x8xf32>, vector<1x16x8xf32>, vector<1x16x16xf32> -> vector<1x16x16xf32>
    "tpu.trace_stop"() : () -> ()
    %cst_11 = arith.constant 0.353553385 : f32
    %33 = vector.broadcast %cst_11 : f32 to vector<1x16x16xf32>
    %34 = arith.mulf %32, %33 : vector<1x16x16xf32>
    %35 = arith.negf %34 : vector<1x16x16xf32>
    %36 = math.exp %35 : vector<1x16x16xf32>
    %cst_12 = arith.constant 1.000000e+00 : f32
    %37 = vector.broadcast %cst_12 : f32 to vector<1x16x16xf32>
    %38 = arith.addf %37, %36 : vector<1x16x16xf32>
    %39 = arith.divf %37, %38 : vector<1x16x16xf32>
    %40 = vector.shape_cast %11 : vector<16x16xf32> to vector<1x16x16xf32>
    %41 = arith.mulf %39, %40 : vector<1x16x16xf32>
    %42 = arith.addf %27, %41 : vector<1x16x16xf32>
    %43 = vector.extract_strided_slice %6 {offsets = [0, 16], sizes = [16, 8], strides = [1, 1]} : vector<16x64xf32> to vector<16x8xf32>
    %44 = vector.shape_cast %43 : vector<16x8xf32> to vector<1x16x8xf32>
    %45 = vector.extract_strided_slice %6 {offsets = [0, 48], sizes = [16, 8], strides = [1, 1]} : vector<16x64xf32> to vector<16x8xf32>
    %46 = vector.shape_cast %45 : vector<16x8xf32> to vector<1x16x8xf32>
    "tpu.trace_start"() <{level = 10 : i32, message = "btd,bsd->bts"}> : () -> ()
    %cst_13 = arith.constant dense<0.000000e+00> : vector<1x16x16xf32>
    %47 = tpu.matmul %44, %46, %cst_13 {dimension_numbers = #tpu.dot_dimension_numbers<[2], [2], [1], [1], [0, 0, 0, 1, 1, 1], [0], [0]>} : vector<1x16x8xf32>, vector<1x16x8xf32>, vector<1x16x16xf32> -> vector<1x16x16xf32>
    "tpu.trace_stop"() : () -> ()
    %cst_14 = arith.constant 0.353553385 : f32
    %48 = vector.broadcast %cst_14 : f32 to vector<1x16x16xf32>
    %49 = arith.mulf %47, %48 : vector<1x16x16xf32>
    %50 = arith.negf %49 : vector<1x16x16xf32>
    %51 = math.exp %50 : vector<1x16x16xf32>
    %cst_15 = arith.constant 1.000000e+00 : f32
    %52 = vector.broadcast %cst_15 : f32 to vector<1x16x16xf32>
    %53 = arith.addf %52, %51 : vector<1x16x16xf32>
    %54 = arith.divf %52, %53 : vector<1x16x16xf32>
    %55 = vector.shape_cast %11 : vector<16x16xf32> to vector<1x16x16xf32>
    %56 = arith.mulf %54, %55 : vector<1x16x16xf32>
    %57 = arith.addf %42, %56 : vector<1x16x16xf32>
    %58 = vector.extract_strided_slice %6 {offsets = [0, 24], sizes = [16, 8], strides = [1, 1]} : vector<16x64xf32> to vector<16x8xf32>
    %59 = vector.shape_cast %58 : vector<16x8xf32> to vector<1x16x8xf32>
    %60 = vector.extract_strided_slice %6 {offsets = [0, 56], sizes = [16, 8], strides = [1, 1]} : vector<16x64xf32> to vector<16x8xf32>
    %61 = vector.shape_cast %60 : vector<16x8xf32> to vector<1x16x8xf32>
    "tpu.trace_start"() <{level = 10 : i32, message = "btd,bsd->bts"}> : () -> ()
    %cst_16 = arith.constant dense<0.000000e+00> : vector<1x16x16xf32>
    %62 = tpu.matmul %59, %61, %cst_16 {dimension_numbers = #tpu.dot_dimension_numbers<[2], [2], [1], [1], [0, 0, 0, 1, 1, 1], [0], [0]>} : vector<1x16x8xf32>, vector<1x16x8xf32>, vector<1x16x16xf32> -> vector<1x16x16xf32>
    "tpu.trace_stop"() : () -> ()
    %cst_17 = arith.constant 0.353553385 : f32
    %63 = vector.broadcast %cst_17 : f32 to vector<1x16x16xf32>
    %64 = arith.mulf %62, %63 : vector<1x16x16xf32>
    %65 = arith.negf %64 : vector<1x16x16xf32>
    %66 = math.exp %65 : vector<1x16x16xf32>
    %cst_18 = arith.constant 1.000000e+00 : f32
    %67 = vector.broadcast %cst_18 : f32 to vector<1x16x16xf32>
    %68 = arith.addf %67, %66 : vector<1x16x16xf32>
    %69 = arith.divf %67, %68 : vector<1x16x16xf32>
    %70 = vector.shape_cast %11 : vector<16x16xf32> to vector<1x16x16xf32>
    %71 = arith.mulf %69, %70 : vector<1x16x16xf32>
    %72 = arith.addf %57, %71 : vector<1x16x16xf32>
    %c0_19 = arith.constant 0 : index
    %c0_20 = arith.constant 0 : index
    %c0_21 = arith.constant 0 : index
    %73 = vector.load %arg4[%c0_19, %c0_20, %c0_21] : memref<1x16x32xf32, #tpu.memory_space<vmem>>, vector<1x16x32xf32>
    "tpu.trace_start"() <{level = 10 : i32, message = "bts,bsd->btd"}> : () -> ()
    %cst_22 = arith.constant dense<0.000000e+00> : vector<1x16x32xf32>
    %74 = tpu.matmul %72, %73, %cst_22 {dimension_numbers = #tpu.dot_dimension_numbers<[2], [1], [1], [2], [0, 0, 0, 1, 1, 2], [0], [0]>} : vector<1x16x16xf32>, vector<1x16x32xf32>, vector<1x16x32xf32> -> vector<1x16x32xf32>
    "tpu.trace_stop"() : () -> ()
    %cst_23 = arith.constant 4.000000e+00 : f32
    %75 = vector.broadcast %cst_23 : f32 to vector<1x16x32xf32>
    %76 = arith.mulf %75, %73 : vector<1x16x32xf32>
    %77 = arith.addf %74, %76 : vector<1x16x32xf32>
    %c0_24 = arith.constant 0 : index
    %c0_25 = arith.constant 0 : index
    %c0_26 = arith.constant 0 : index
    %78 = vector.load %arg5[%c0_24, %c0_25, %c0_26] : memref<1x16x32xf32, #tpu.memory_space<vmem>>, vector<1x16x32xf32>
    tpu.vector_store %arg5[%c0_24, %c0_25, %c0_26], %77 {strides = array<i32>} : memref<1x16x32xf32, #tpu.memory_space<vmem>>, vector<1x16x32xf32>,
    return
  }
  func.func @transform_0(%arg0: i32) -> (i32, i32, i32) {
    %c0_i32 = arith.constant 0 : i32
    %c0_i32_0 = arith.constant 0 : i32
    %c0_i32_1 = arith.constant 0 : i32
    return %arg0, %c0_i32, %c0_i32_0 : i32, i32, i32
  }
  func.func @transform_1(%arg0: i32) -> (i32, i32) {
    %c0_i32 = arith.constant 0 : i32
    %c0_i32_0 = arith.constant 0 : i32
    %c0_i32_1 = arith.constant 0 : i32
    return %c0_i32, %c0_i32_0 : i32, i32
  }
  func.func @transform_2(%arg0: i32) -> (i32, i32) {
    %c0_i32 = arith.constant 0 : i32
    %c0_i32_0 = arith.constant 0 : i32
    %c0_i32_1 = arith.constant 0 : i32
    return %c0_i32, %c0_i32_0 : i32, i32
  }
  func.func @transform_3(%arg0: i32) -> (i32, i32, i32) {
    %c0_i32 = arith.constant 0 : i32
    %c0_i32_0 = arith.constant 0 : i32
    %c0_i32_1 = arith.constant 0 : i32
    return %arg0, %c0_i32, %c0_i32_0 : i32, i32, i32
  }
  func.func @transform_4(%arg0: i32) -> (i32, i32, i32) {
    %c0_i32 = arith.constant 0 : i32
    %c0_i32_0 = arith.constant 0 : i32
    %c0_i32_1 = arith.constant 0 : i32
    return %arg0, %c0_i32, %c0_i32_0 : i32, i32, i32
  }
}

</mosaic_0001>

<bundles_post_ra>
// kernel: tpu_custom_call.1
= control target key start
LH: loop header
LB: loop body
LE: loop exit
PB: predicated region body
PF: predicated region fallthrough
CT: control target
= control target key end

     0   :  { %9 = vsyncpa [#allocation3], 0  ;;  %s1562_s0 = inlined_call_operand.hbm [shape: f32[2,16,32], index: 0, kind: input, shape index: {}]   ;;  %s1563_s1 = inlined_call_operand.hbm [shape: f32[32,64], index: 1, kind: input, shape index: {}]   ;;  %s1564_s2 = inlined_call_operand.vmem [shape: f32[1,64], index: 2, kind: input, shape index: {}]   ;;  %s1565_s3 = inlined_call_operand.hbm [shape: f32[2,16,32], index: 3, kind: input, shape index: {}]   ;;  %s1566_s4 = inlined_call_operand.hbm [shape: f32[2,16,32], index: 4, kind: output, shape index: {}]  }
   0x1   :  { %11 = vsyncpa [#allocation3 + $0x1], 0 }
   0x2   :  { %12 = vsyncpa [#allocation6], 0 }
   0x3   :  { %13 = vsyncpa [#allocation4], 0 }
   0x4   :  { %15 = vsyncpa [#allocation4 + $0x1], 0  ;;  %s1181_s15 = smov 0   ;;  %s1183_s16 = smov 0  }
   0x5   :  { %s1185_s17 = smov 0   ;;  %s1187_s18 = smov 0  }
   0x6 LB: > { %s1202_s19 = sadd.s32 1, %s1141_s18   ;;  %s28_s20 = sadd.s32 1, %s1137_s17  ;;  %s1141_s18 = sphi %s1187_s18, %s1596_s18   ;;  %s1137_s17 = sphi %s1185_s17, %s1595_s17   ;;  %s1133_s16 = sphi %s1183_s16, %s1594_s16   ;;  %s1129_s15 = sphi %s1181_s15, %s1593_s15  }
   0x7   : > { %s25_s21 = ssub.s32 %s1141_s18, %s1202_s19  ;;  %p35_p0 = scmp.ne.s32.totalorder %s1137_s17, %s1133_s16 }
   0x8   : > { %p26_p1 = scmp.eq.s32.totalorder %s25_s21, 0  ;;  %p36_p2 = scmp.eq.s32.totalorder %s1141_s18, 0 }
   0x9   : > { %p896_p5 = scmp.lt.s32.totalorder %s1141_s18, 2  ;;  %s176_s23 = sand.u32 1, %s1141_s18  }
   0xa   : > { %s1211_s22 = scalar_select %p26_p1, %s1137_s17, %s28_s20  }
   0xb   : > { %p37_p4 = por %p36_p2, %p35_p0  ;;  %s178_s24 = sand.u32 1, %s1137_s17  }
   0xc   : > { %s1220_s25 = sshll.u32 %s178_s24, 4  ;;  %s861_s26 = sshll.u32 %s1141_s18, 4 }
   0xd   : > { %s185_s29 = scalar_lea.hbm %s1562_s0, %s861_s26  ;;  %s180_s5 = scalar_lea.vmem [#allocation2], %s1220_s25 }
   0xe   : > { %s186_s30 = sshll.u32 %s185_s29, 4  ;;  %s188_s6 = sshll.u32 %s180_s5, 4  ;;  %s187_s30 = int_to_ptr.hbm [resolvable:$true] %s186_s30  ;;  %s189_s6 = int_to_ptr.vmem [resolvable:$true] %s188_s6 }
   0xf   : > { %p1227_p6 = pnand %p896_p5, %p37_p4  ;;  %s207_s10 = scalar_lea.hbm %s1565_s3, %s861_s26 }
  0x10   : > { %s208_s11 = sshll.u32 %s207_s10, 4  ;;  %s1234_s12 = scalar_lea.sflag [#allocation3], %s176_s23  ;;  %s1253_s11 = int_to_ptr.hbm [resolvable:$true] %s208_s11 }
  0x11   : > { %s977_s13 = sshra.s32 %s187_s30, 4  ;;  %p981_p8 = pneg %p1227_p6  ;;  %s978_s13 = int_to_ptr.hbm [resolvable:$true] %s977_s13 }
  0x12   : > { %s979_s14 = scalar_lea.hbm %s978_s13, 16  ;;  %s984_s24 = scalar_lea.hbm %s1562_s0, 32 }
  0x13   : > { %p980_p7 = scmp.ne.s32.totalorder %s978_s13, %s979_s14  ;;  %p985_p11 = scmp.lt.s32.totalorder %s978_s13, %s1562_s0 }
  0x14   : > { %p986_p12 = scmp.lt.s32.totalorder %s984_s24, %s979_s14 }
  0x15   : > { %p982_p9 = pnand %p981_p8, %p980_p7 }
  0x16   : > { %p987_p13 = por %p986_p12, %p985_p11 }
  0x17   : > { %p983_p10 = pneg %p982_p9 }
  0x19   : > { %p988_p1 = pnand %p987_p13, %p983_p10 }
  0x1b   : > { %991 = shalt.err (!%p988_p1)
}
  0x1c   : > { %s1567_s23 = smov 128   ;;  %s1144_s26 = smov 8  }
  0x1d   : > { %887 = dma.hbm_to_vmem [thread:$0]  (!%p1227_p6), %s187_s30, 256, %s189_s6, %s1234_s12, %s1567_s23, %s1567_s23, %s1144_s26  }
  0x1e   : > { %s202_s29 = scalar_lea.vmem [#allocation7], %s1220_s25  ;;  %s1259_s8 = sadd.s32 4294967295, %s1141_s18  }
  0x1f   : > { %s1256_s5 = sshll.u32 %s202_s29, 4  ;;  %s811_s9 = sadd.s32 4294967294, %s1141_s18   ;;  %s211_s5 = int_to_ptr.vmem [resolvable:$true] %s1256_s5 }
  0x20   : > { %p41_p2 = scmp.ne.s32.totalorder %s1133_s16, %s1129_s15  ;;  %p42_p4 = scmp.eq.s32.totalorder %s1259_s8, 0 }
  0x21   : > { %p133_p5 = scmp.eq.s32.totalorder %s1259_s8, 1  ;;  %p139_p7 = scmp.eq.s32.totalorder %s811_s9, 1 }
  0x22   : > { %p1268_p9 = por %p42_p4, %p41_p2  ;;  %p812_p10 = scmp.ge.s32.totalorder %s1141_s18, 1 }
  0x23   : > { %p1276_p11 = por %p133_p5, %p35_p0  ;;  %p1280_p12 = por %p139_p7, %p41_p2 }
  0x24   : > { %p146_p13 = scmp.lt.s32.totalorder %s1141_s18, 3  ;;  %s157_s14 = sshll.u32 %s1563_s1, 4  ;;  %s158_s14 = int_to_ptr.hbm [resolvable:$true] %s157_s14 }
  0x25   : > { %s1145_s21 = smov [#allocation5]   ;;  %s1007_s27 = sshra.s32 %s1253_s11, 4  ;;  %s1008_s27 = int_to_ptr.hbm [resolvable:$true] %s1007_s27 }
  0x26   : > { %p1289_p1 = pnand %p812_p10, %p146_p13  ;;  %s159_s24 = sshll.u32 %s1145_s21, 4  ;;  %s160_s24 = int_to_ptr.vmem [resolvable:$true] %s159_s24 }
  0x27   : > { %s1009_s28 = scalar_lea.hbm %s1008_s27, 16  ;;  %s1014_s10 = scalar_lea.hbm %s1565_s3, 32 }
  0x28   : > { %p1010_p2 = scmp.ne.s32.totalorder %s1008_s27, %s1009_s28  ;;  %p1015_p10 = scmp.lt.s32.totalorder %s1008_s27, %s1565_s3 }
  0x29   : > { %p1016_p13 = scmp.lt.s32.totalorder %s1014_s10, %s1009_s28 }
  0x2a   : > { %p1012_p5 = pnand %p1010_p2, %p981_p8 }
  0x2b   : > { %p1017_p3 = por %p1016_p13, %p1015_p10 }
  0x2c   : > { %p1013_p7 = pneg %p1012_p5 }
  0x2e   : > { %p1018_p0 = pnand %p1017_p3, %p1013_p7 }
  0x30   : > { %1021 = shalt.err (!%p1018_p0)
}
  0x31   : > { %s1574_s21 = smov 128   ;;  %p1575_p8 = pneg %p1289_p1 }
  0x32   : > { %890 = dma.hbm_to_vmem [thread:$0]  (!%p1227_p6), %s1253_s11, 256, %s211_s5, %s1234_s12, %s1574_s21, %s1574_s21, %s1144_s26  }
  0x33   : > { %p881_p2 = pnand %p1575_p8, %p42_p4  ;;  %222 = sbr.rel (%p1289_p1) target bundleno = 646 (0x286), region = 36 }
  0x34   : > { %s224_s7 = sand.u32 (!%p1289_p1), 1, %s1259_s8   ;;  %s226_s23 = sand.u32 (!%p1289_p1), 1, %s1133_s16  }
  0x35   : > { %883 = dma.hbm_to_vmem [thread:$0]  (!%p881_p2), %s158_s14, 512, %s160_s24, [#allocation6], %s1574_s21, %s1574_s21, %s1144_s26  }
  0x36   : > { %s1326_s11 = sshll.u32 (!%p1289_p1), %s226_s23, 4  ;;  %s225_s12 = scalar_lea.sflag (!%p1289_p1), [#allocation3], %s224_s7 }
  0x37   : > { %s228_s5 = scalar_lea.vmem (!%p1289_p1), [#allocation2], %s1326_s11 }
  0x38   : > { %1112 = dma.done.wait (%p1268_p9), %s225_s12, 256  }
  0x39   : > { %1114 = vsyncadd (%p1268_p9), %s225_s12, 4294967040 }
  0x3a   : > { %1116 = dma.done.wait (%p42_p4), [#allocation6], 512  }
  0x3b   : > { %1118 = vsyncadd (%p42_p4), [#allocation6], 4294966784  ;;  %s243_s26 = scalar_lea.vmem [#allocation7], %s1326_s11 }
  0x3c   : > { %1120 = dma.done.wait (%p1268_p9), %s225_s12, 256  }
  0x3d   : > { %1122 = vsyncadd (%p1268_p9), %s225_s12, 4294967040  ;;  %v279_v0 = vld [vmem:[#allocation5 + $0x18] sm:$0xff]  ;;  %v278_v1 = vld [vmem:[#allocation5 + $0x10] sm:$0xff]  ;;  %vm284_vm0 = vcmask 261120   ;;  %s1146_s20 = smov 88   ;;  %s1147_s24 = smov 96   ;;  %v314_v36 = vlaneseq }
  0x3e   : > { %303 = vmatpush.msra.mxu0 %v279_v0  ;;  %864 = vmatpush.msra.mxu2 %v279_v0  ;;  %v277_v2 = vld [vmem:[#allocation5 + $0x8] sm:$0xff]  ;;  %v276_v3 = vld [vmem:[#allocation5] sm:$0xff]  ;;  %s1148_s27 = smov 80   ;;  %s1149_s28 = smov 72   ;;  %vm331_vm1 = vcmask 64512  }
  0x3f   : > { %v274_v4 = vld [vmem:[%s228_s5] sm:$0xff]  ;;  %v275_v5 = vld [vmem:[%s228_s5 + $0x8] sm:$0xff]  ;;  %s1150_s29 = smov 120   ;;  %s1151_s9 = smov 112   ;;  %v315_v39 = vshrl.u32 %v314_v36, 7  ;;  %v318_v43 = vand.u32 127, %v314_v36 }
  0x40   : > { %304 = vmatpush.msra.mxu0 %v278_v1  ;;  %865 = vmatpush.msra.mxu2 %v278_v1  ;;  %v944_v6 = vld [vmem:[%s1564_s2] ss:$0 sm:$0xff]  ;;  %s1152_s10 = smov 104   ;;  %v1372_v47 = vld [vmem:[%s243_s26 + $0x8] sm:$0xff]  ;;  %s863_s13 = sshll.u32 %s1259_s8, 4 }
  0x41   : > { %v1376_v48 = vld [vmem:[%s243_s26] sm:$0xff]  ;;  %v316_v49 = vadd.s32 8, %v315_v39  ;;  %vm319_vm2 = vcmp.lt.s32.totalorder %v318_v43, %v315_v39  ;;  %s273_s21 = scalar_lea.vmem [#allocation8], %s1326_s11  ;;  %s704_s5 = scalar_lea.hbm %s1566_s4, %s863_s13 }
  0x42   : > { %305 = vmatpush.msra.mxu0 %v277_v2  ;;  %866 = vmatpush.msra.mxu2 %v277_v2  ;;  %v1153_v2 = vmov 0.0   ;;  %s705_s26 = sshll.u32 %s273_s21, 4  ;;  %s707_s30 = sshll.u32 %s704_s5, 4  ;;  %s706_s26 = int_to_ptr.vmem [resolvable:$true] %s705_s26  ;;  %s708_s30 = int_to_ptr.hbm [resolvable:$true] %s707_s30 }
  0x43   : > { %vm320_vm3 = vcmp.lt.s32.totalorder %v318_v43, %v316_v49  ;;  %s693_s8 = scalar_lea.sflag [#allocation4], %s226_s23  ;;  %s1081_s11 = sshra.s32 %s708_s30, 4  ;;  %s1082_s11 = int_to_ptr.hbm [resolvable:$true] %s1081_s11 }
  0x44   : > { %306 = vmatpush.msra.mxu0 %v276_v3  ;;  %867 = vmatpush.msra.mxu2 %v276_v3  ;;  %v1391_v3 = vsel %vm319_vm2, 1.0, %v1153_v2  ;;  %s1083_s14 = scalar_lea.hbm %s1082_s11, 16  ;;  %p1088_p9 = scmp.lt.s32.totalorder %s1082_s11, %s1566_s4 }
  0x45   : > { %826 = vmatmul.msk.f32.vlgmr.msra.gmra.mxu0 %vm284_vm0, %v274_v4  ;;  %827 = vmatmul.msk.f32.vlgmr.msra.gmra.mxu2 %vm284_vm0, %v275_v5  ;;  %v1393_v4 = vsel %vm320_vm3, 1.0, %v1153_v2  ;;  %p1084_p3 = scmp.ne.s32.totalorder %s1082_s11, %s1083_s14 }
  0x47   : > { %p1085_p6 = pnand %p1084_p3, %p1276_p11 }
  0x49   : > { %p1086_p4 = pneg %p1085_p6 }
  0xc2   : > { %v308_v7 = vpop.f32.mrf.mxu0 }
  0xc3   : > { %v309_v8 = vadd.f32 %v944_v6, %v308_v7 }
  0xc5   : > { %411 = vrot.lane.b32.xlu2 %v309_v8, %s1146_s20  ;;  %327 = vrot.lane.b32.xlu0 %v309_v8, %s1147_s24 }
  0xc8   : > { %v311_v9 = vpop.f32.mrf.mxu2 }
  0xc9   : > { %v312_v10 = vadd.f32 %v944_v6, %v311_v9 }
  0xcb   : > { %413 = vrot.lane.b32.xlu1 %v312_v10, %s1146_s20 }
  0xcd   : > { %494 = vrot.lane.b32.xlu2 %v309_v8, %s1148_s27  ;;  %329 = vrot.lane.b32.xlu0 %v312_v10, %s1147_s24 }
  0xd3   : > { %496 = vrot.lane.b32.xlu1 %v312_v10, %s1148_s27  ;;  %s1087_s27 = scalar_lea.hbm %s1566_s4, 32 }
  0xd4   : > { %p1089_p1 = scmp.lt.s32.totalorder %s1087_s27, %s1083_s14 }
  0xd5   : > { %579 = vrot.lane.b32.xlu2 %v312_v10, %s1149_s28  ;;  %407 = vrot.lane.b32.xlu0 %v309_v8, %s1150_s29 }
  0xd6   : > { %p1090_p0 = por %p1089_p1, %p1088_p9 }
  0xd8   : > { %p1091_p5 = pnand %p1090_p0, %p1086_p4 }
  0xdb   : > { %490 = vrot.lane.b32.xlu1 %v309_v8, %s1151_s9 }
  0xdd   : > { %492 = vrot.lane.b32.xlu2 %v312_v10, %s1151_s9  ;;  %577 = vrot.lane.b32.xlu0 %v309_v8, %s1149_s28 }
  0xe3   : > { %409 = vrot.lane.b32.xlu1 %v312_v10, %s1150_s29 }
  0xe5   : > { %573 = vrot.lane.b32.xlu0 %v309_v8, %s1152_s10 }
  0xeb   : > { %575 = vrot.lane.b32.xlu1 %v312_v10, %s1152_s10 }
 0x11f   : > { %v412_v11 = vpop.permute.xlu2 %411 }
 0x127   : > { %v495_v12 = vpop.permute.xlu2 %494 }
 0x12f   : > { %v580_v13 = vpop.permute.xlu2 %579 }
 0x130   : > { %848 = vmatpush.xpose.msk.msrb.mxu0 %vm331_vm1, %v580_v13 }
 0x137   : > { %v328_v14 = vpop.permute.xlu0 %327  ;;  %v493_v22 = vpop.permute.xlu2 %492 }
 0x13d   : > { %v414_v15 = vpop.permute.xlu1 %413 }
 0x13e   : > { %836 = vmatpush.xpose.msk.msrb.mxu2 %vm331_vm1, %v414_v15 }
 0x13f   : > { %v330_v16 = vpop.permute.xlu0 %329 }
 0x140   : > { %830 = vmatpush.xpose.msk.msra.mxu1 %vm331_vm1, %v330_v16  ;;  %868 = vmatpush.xpose.msk.msra.mxu3 %vm331_vm1, %v330_v16 }
 0x142   : > { %837 = vmatpush.xpose.msk.msrb.mxu2 %vm331_vm1, %v412_v11 }
 0x144   : > { %831 = vmatpush.xpose.msk.msra.mxu1 %vm331_vm1, %v328_v14  ;;  %869 = vmatpush.xpose.msk.msra.mxu3 %vm331_vm1, %v328_v14 }
 0x145   : > { %v497_v17 = vpop.permute.xlu1 %496 }
 0x147   : > { %832 = vmatmul.msk.f32.vlgmr.msra.gmra.mxu1 %vm331_vm1, %v309_v8  ;;  %833 = vmatmul.msk.f32.vlgmr.msra.gmra.mxu3 %vm331_vm1, %v312_v10  ;;  %v408_v18 = vpop.permute.xlu0 %407 }
 0x148   : > { %842 = vmatpush.xpose.msk.msrb.mxu3 %vm331_vm1, %v497_v17  ;;  %838 = vmatmul.msk.f32.vlgmr.msrb.gmra.mxu2 %vm331_vm1, %v408_v18 }
 0x149   : > { %681 = vmatpush.msrb.mxu1 %v1372_v47 }
 0x14b   : > { %682 = vmatpush.msrb.mxu1 %v1376_v48 }
 0x14c   : > { %843 = vmatpush.xpose.msk.msrb.mxu3 %vm331_vm1, %v495_v12 }
 0x14d   : > { %v491_v19 = vpop.permute.xlu1 %490 }
 0x14f   : > { %844 = vmatmul.msk.f32.vlgmr.msrb.gmra.mxu3 %vm331_vm1, %v491_v19  ;;  %v578_v20 = vpop.permute.xlu0 %577 }
 0x150   : > { %849 = vmatpush.xpose.msk.msrb.mxu0 %vm331_vm1, %v578_v20 }
 0x155   : > { %v410_v21 = vpop.permute.xlu1 %409 }
 0x156   : > { %839 = vmatmul.msk.f32.gmra.mxu2 %vm331_vm1, %v410_v21 }
 0x157   : > { %845 = vmatmul.msk.f32.gmra.mxu3 %vm331_vm1, %v493_v22  ;;  %v574_v23 = vpop.permute.xlu0 %573 }
 0x158   : > { %850 = vmatmul.msk.f32.vlgmr.msrb.gmra.mxu0 %vm331_vm1, %v574_v23 }
 0x15d   : > { %v576_v24 = vpop.permute.xlu1 %575 }
 0x160   : > { %851 = vmatmul.msk.f32.gmra.mxu0 %vm331_vm1, %v576_v24 }
 0x1c4   : > { %v357_v25 = vpop.f32.mrf.mxu1 }
 0x1c5   : > { %v834_v26 = vmul.f32 -0.35355338, %v357_v25 }
 0x1c7   : > { %v367_v27 = vmul.f32 1.442695, %v834_v26 }
 0x1c9   : > { %945 = vpow2.f32 %v367_v27 }
 0x1ca   : > { %v360_v28 = vpop.f32.mrf.mxu3 }
 0x1cb   : > { %v835_v29 = vmul.f32 -0.35355338, %v360_v28  ;;  %v440_v30 = vpop.f32.mrf.mxu2 }
 0x1cc   : > { %v840_v31 = vmul.f32 -0.35355338, %v440_v30 }
 0x1cd   : > { %v369_v32 = vmul.f32 1.442695, %v835_v29 }
 0x1ce   : > { %v450_v33 = vmul.f32 1.442695, %v840_v31 }
 0x1cf   : > { %v946_v34 = vpop.eup %945  ;;  %947 = vpow2.f32 %v369_v32 }
 0x1d0   : > { %v1365_v35 = vadd.f32 1.0, %v946_v34  ;;  %949 = vpow2.f32 %v450_v33 }
 0x1d2   : > { %951 = vrcp.f32 %v1365_v35  ;;  %v523_v37 = vpop.f32.mrf.mxu3  ;;  %v384_v58 = vand.u32 2147483648, %v1365_v35  ;;  %v382_v60 = vand.u32 2147483647, %v1365_v35  ;;  %vm378_vm4 = vweird.f32 %v1365_v35 }
 0x1d3   : > { %v846_v38 = vmul.f32 -0.35355338, %v523_v37 }
 0x1d4   : > { %v385_v9 = vor.u32 1.1754944e-38, %v384_v58  ;;  %vm1404_vm6 = vcmp.eq.f32.partialorder %v382_v60, 8.507059e+37 }
 0x1d5   : > { %v948_v40 = vpop.eup %947  ;;  %v533_v41 = vmul.f32 1.442695, %v846_v38  ;;  %v606_v42 = vpop.f32.mrf.mxu0 }
 0x1d6   : > { %v950_v44 = vpop.eup %949  ;;  %v1368_v45 = vadd.f32 1.0, %v948_v40  ;;  %v852_v46 = vmul.f32 -0.35355338, %v606_v42 }
 0x1d7   : > { %v1378_v50 = vadd.f32 1.0, %v950_v44  ;;  %953 = vpow2.f32 %v533_v41 }
 0x1d8   : > { %v1381_v51 = vpop.eup %951  ;;  %955 = vrcp.f32 %v1368_v45  ;;  %v616_v52 = vmul.f32 1.442695, %v852_v46  ;;  %v399_v11 = vand.u32 2147483648, %v1368_v45  ;;  %vm393_vm7 = vweird.f32 %v1368_v45 }
 0x1d9   : > { %v374_v53 = vmul.f32 %v1381_v51, %v1365_v35  ;;  %957 = vrcp.f32 %v1378_v50  ;;  %v443_v54 = vpop.f32.mrf.mxu2  ;;  %vm379_vm5 = vweird.f32 %v1381_v51  ;;  %v465_v15 = vand.u32 2147483647, %v1378_v50 }
 0x1da   : > { %959 = vpow2.f32 %v616_v52  ;;  %v841_v55 = vmul.f32 -0.35355338, %v443_v54  ;;  %v526_v56 = vpop.f32.mrf.mxu3  ;;  %vm461_vm8 = vweird.f32 %v1378_v50  ;;  %v467_v21 = vand.u32 2147483648, %v1378_v50  ;;  %vm1424_vm9 = vmor %vm378_vm4, %vm379_vm5 }
 0x1db   : > { %v375_v57 = vsub.f32 1.0, %v374_v53  ;;  %v847_v59 = vmul.f32 -0.35355338, %v526_v56  ;;  %v397_v23 = vand.u32 2147483647, %v1368_v45  ;;  %v400_v24 = vor.u32 1.1754944e-38, %v399_v11 }
 0x1dc   : > { %v452_v61 = vmul.f32 1.442695, %v841_v55  ;;  %vm1429_vm11 = vcmp.eq.f32.partialorder %v465_v15, 8.507059e+37  ;;  %v468_v39 = vor.u32 1.1754944e-38, %v467_v21 }
 0x1dd   : > { %v954_v62 = vpop.eup %953  ;;  %v376_v63 = vmul.f32 %v1381_v51, %v375_v57  ;;  %v535_v0 = vmul.f32 1.442695, %v847_v59  ;;  %v609_v1 = vpop.f32.mrf.mxu0  ;;  %vm1451_vm14 = vcmp.eq.f32.partialorder %v397_v23, 8.507059e+37 }
 0x1de   : > { %v1395_v5 = vpop.eup %955  ;;  %v1398_v6 = vadd.f32 1.0, %v954_v62  ;;  %961 = vpow2.f32 %v452_v61  ;;  %v853_v7 = vmul.f32 -0.35355338, %v609_v1 }
 0x1df   : > { %v958_v8 = vpop.eup %957  ;;  %v389_v10 = vmul.f32 %v1395_v5, %v1368_v45  ;;  %963 = vpow2.f32 %v535_v0  ;;  %v377_v16 = vadd.f32 %v1381_v51, %v376_v63  ;;  %vm394_vm12 = vweird.f32 %v1395_v5 }
 0x1e0   : > { %v960_v12 = vpop.eup %959  ;;  %v457_v14 = vmul.f32 %v958_v8, %v1378_v50  ;;  %965 = vrcp.f32 %v1398_v6  ;;  %v618_v19 = vmul.f32 1.442695, %v853_v7  ;;  %vm462_vm10 = vweird.f32 %v958_v8  ;;  %vm1463_vm1 = vmor %vm393_vm7, %vm394_vm12 }
 0x1e1   : > { %v390_v17 = vsub.f32 1.0, %v389_v10  ;;  %v1412_v18 = vadd.f32 1.0, %v960_v12  ;;  %v550_v28 = vand.u32 2147483648, %v1398_v6  ;;  %v381_v32 = vsel %vm1424_vm9, %v1381_v51, %v377_v16  ;;  %vm1445_vm13 = vmor %vm461_vm8, %vm462_vm10 }
 0x1e2   : > { %v458_v20 = vsub.f32 1.0, %v457_v14  ;;  %v548_v36 = vand.u32 2147483647, %v1398_v6  ;;  %vm544_vm15 = vweird.f32 %v1398_v6  ;;  %v386_v50 = vsel %vm1404_vm6, %v385_v9, %v381_v32 }
 0x1e3   : > { %v391_v22 = vmul.f32 %v1395_v5, %v390_v17  ;;  %967 = vrcp.f32 %v1412_v18  ;;  %v551_v42 = vor.u32 1.1754944e-38, %v550_v28  ;;  %vm627_vm2 = vweird.f32 %v1412_v18 }
 0x1e4   : > { %v962_v25 = vpop.eup %961  ;;  %v459_v27 = vmul.f32 %v958_v8, %v458_v20  ;;  %969 = vpow2.f32 %v618_v19  ;;  %vm1476_vm3 = vcmp.eq.f32.partialorder %v548_v36, 8.507059e+37  ;;  %v631_v55 = vand.u32 2147483647, %v1412_v18 }
 0x1e5   : > { %v964_v29 = vpop.eup %963  ;;  %v1433_v31 = vadd.f32 1.0, %v962_v25  ;;  %v392_v37 = vadd.f32 %v1395_v5, %v391_v22  ;;  %v633_v58 = vand.u32 2147483648, %v1412_v18  ;;  %v403_v60 = vmul.f32 %v1391_v3, %v386_v50 }
 0x1e6   : > { %v966_v33 = vpop.eup %965  ;;  %v460_v34 = vadd.f32 %v958_v8, %v459_v27  ;;  %v1439_v35 = vadd.f32 1.0, %v964_v29  ;;  %vm660_vm6 = vcmask 130048   ;;  %vm1494_vm9 = vcmp.eq.f32.partialorder %v631_v55, 8.507059e+37 }
 0x1e7   : > { %v540_v40 = vmul.f32 %v966_v33, %v1398_v6  ;;  %971 = vrcp.f32 %v1433_v31  ;;  %v396_v51 = vsel %vm1463_vm1, %v1395_v5, %v392_v37  ;;  %vm545_vm4 = vweird.f32 %v966_v33 }
 0x1e8   : > { %973 = vrcp.f32 %v1439_v35  ;;  %v464_v43 = vsel %vm1445_vm13, %v958_v8, %v460_v34  ;;  %vm476_vm5 = vweird.f32 %v1433_v31  ;;  %v401_v61 = vsel %vm1451_vm14, %v400_v24, %v396_v51  ;;  %vm546_vm7 = vmor %vm544_vm15, %vm545_vm4 }
 0x1e9   : > { %v968_v46 = vpop.eup %967  ;;  %v541_v49 = vsub.f32 1.0, %v540_v40  ;;  %v469_v45 = vsel %vm1429_vm11, %v468_v39, %v464_v43  ;;  %v482_v63 = vand.u32 2147483648, %v1433_v31  ;;  %v634_v11 = vor.u32 1.1754944e-38, %v633_v58 }
 0x1ea   : > { %v970_v52 = vpop.eup %969  ;;  %v623_v53 = vmul.f32 %v968_v46, %v1412_v18  ;;  %v486_v0 = vmul.f32 %v1391_v3, %v469_v45  ;;  %vm628_vm8 = vweird.f32 %v968_v46  ;;  %v404_v12 = vmul.f32 %v1393_v4, %v401_v61 }
 0x1eb   : > { %v542_v56 = vmul.f32 %v966_v33, %v541_v49  ;;  %v1481_v57 = vadd.f32 1.0, %v970_v52  ;;  %v480_v15 = vand.u32 2147483647, %v1433_v31  ;;  %vm629_vm10 = vmor %vm627_vm2, %vm628_vm8  ;;  %v563_v20 = vand.u32 2147483647, %v1439_v35 }
 0x1ec   : > { %v624_v59 = vsub.f32 1.0, %v623_v53  ;;  %v488_v17 = vadd.f32 %v486_v0, %v403_v60  ;;  %v565_v23 = vand.u32 2147483648, %v1439_v35  ;;  %v483_v30 = vor.u32 1.1754944e-38, %v482_v63 }
 0x1ed   : > { %v972_v62 = vpop.eup %971  ;;  %975 = vrcp.f32 %v1481_v57  ;;  %v543_v1 = vadd.f32 %v966_v33, %v542_v56  ;;  %vm481_vm14 = vcmp.eq.f32.partialorder %v480_v15, 8.507059e+37  ;;  %vm559_vm15 = vweird.f32 %v1439_v35 }
 0x1ee   : > { %v974_v2 = vpop.eup %973  ;;  %v625_v5 = vmul.f32 %v968_v46, %v624_v59  ;;  %v472_v7 = vmul.f32 %v972_v62, %v1433_v31  ;;  %vm477_vm11 = vweird.f32 %v972_v62  ;;  %vm564_vm1 = vcmp.eq.f32.partialorder %v563_v20, 8.507059e+37 }
 0x1ef   : > { %v555_v9 = vmul.f32 %v974_v2, %v1439_v35  ;;  %v547_v10 = vsel %vm546_vm7, %v966_v33, %v543_v1  ;;  %vm560_vm12 = vweird.f32 %v974_v2  ;;  %vm478_vm13 = vmor %vm476_vm5, %vm477_vm11  ;;  %v566_v37 = vor.u32 1.1754944e-38, %v565_v23 }
 0x1f0   : > { %v473_v13 = vsub.f32 1.0, %v472_v7  ;;  %v552_v14 = vsel %vm1476_vm3, %v551_v42, %v547_v10  ;;  %v626_v6 = vadd.f32 %v968_v46, %v625_v5  ;;  %vm561_vm2 = vmor %vm559_vm15, %vm560_vm12  ;;  %v646_v40 = vand.u32 2147483647, %v1481_v57 }
 0x1f1   : > { %v556_v16 = vsub.f32 1.0, %v555_v9  ;;  %v569_v19 = vmul.f32 %v1391_v3, %v552_v14  ;;  %vm642_vm4 = vweird.f32 %v1481_v57  ;;  %v658_v45 = vmul.f32 4.0, %v1376_v48 }
 0x1f2   : > { %v474_v21 = vmul.f32 %v972_v62, %v473_v13  ;;  %v630_v22 = vsel %vm629_vm10, %v968_v46, %v626_v6  ;;  %vm647_vm7 = vcmp.eq.f32.partialorder %v646_v40, 8.507059e+37 }
 0x1f3   : > { %v976_v24 = vpop.eup %975  ;;  %v557_v25 = vmul.f32 %v974_v2, %v556_v16  ;;  %v571_v26 = vadd.f32 %v569_v19, %v488_v17  ;;  %v635_v27 = vsel %vm1494_vm9, %v634_v11, %v630_v22 }
 0x1f4   : > { %v638_v28 = vmul.f32 %v976_v24, %v1481_v57  ;;  %v652_v29 = vmul.f32 %v1391_v3, %v635_v27  ;;  %v475_v18 = vadd.f32 %v972_v62, %v474_v21  ;;  %v648_v3 = vand.u32 2147483648, %v1481_v57 }
 0x1f5   : > { %v558_v32 = vadd.f32 %v974_v2, %v557_v25  ;;  %vm643_vm3 = vweird.f32 %v976_v24 }
 0x1f6   : > { %v639_v33 = vsub.f32 1.0, %v638_v28  ;;  %v654_v34 = vadd.f32 %v652_v29, %v571_v26  ;;  %v479_v36 = vsel %vm478_vm13, %v972_v62, %v475_v18  ;;  %vm644_vm5 = vmor %vm642_vm4, %vm643_vm3  ;;  %v649_v46 = vor.u32 1.1754944e-38, %v648_v3 }
 0x1f7   : > { %v484_v38 = vsel %vm481_vm14, %v483_v30, %v479_v36  ;;  %v562_v39 = vsel %vm561_vm2, %v974_v2, %v558_v32 }
 0x1f8   : > { %854 = vmatmul.msk.f32.vlgmr.msrb.gmra.mxu1 %vm660_vm6, %v654_v34  ;;  %v487_v31 = vmul.f32 %v1393_v4, %v484_v38  ;;  %v567_v41 = vsel %vm564_vm1, %v566_v37, %v562_v39  ;;  %v640_v42 = vmul.f32 %v976_v24, %v639_v33 }
 0x1f9   : > { %v570_v35 = vmul.f32 %v1393_v4, %v567_v41 }
 0x1fa   : > { %v489_v43 = vadd.f32 %v487_v31, %v404_v12  ;;  %v641_v44 = vadd.f32 %v976_v24, %v640_v42 }
 0x1fc   : > { %v572_v49 = vadd.f32 %v570_v35, %v489_v43  ;;  %v645_v50 = vsel %vm644_vm5, %v976_v24, %v641_v44 }
 0x1fd   : > { %v650_v51 = vsel %vm647_vm7, %v649_v46, %v645_v50 }
 0x1fe   : > { %v653_v52 = vmul.f32 %v1393_v4, %v650_v51  ;;  %v659_v4 = vmul.f32 4.0, %v1372_v47 }
 0x200   : > { %v655_v53 = vadd.f32 %v653_v52, %v572_v49 }
 0x202   : > { %855 = vmatmul.msk.f32.gmra.mxu1 %vm660_vm6, %v655_v53 }
 0x275   : > { %v684_v54 = vpop.f32.mrf.mxu1 }
 0x276   : > { %v685_v55 = vadd.f32 %v684_v54, %v658_v45 }
 0x278   : > { %690 = vst.msk [vmem:[%s273_s21] sm:$0xff] %vm284_vm0, %v685_v55 }
 0x27f   : > { %v687_v56 = vpop.f32.mrf.mxu1 }
 0x280   : > { %v688_v57 = vadd.f32 %v687_v56, %v659_v4 }
 0x282   : > { %691 = vst.msk [vmem:[%s273_s21 + $0x8] sm:$0xff] %vm284_vm0, %v688_v57 }
 0x283   : > { %1094 = shalt.err (!%p1091_p5)
}
 0x284   : > { %s1154_s23 = smov 128   ;;  %s1155_s9 = smov 8  }
 0x285   : > { %878 = dma.vmem_to_hbm [thread:$0]  (%p1276_p11), %s706_s26, 256, %s708_s30, %s693_s8, %s1154_s23, %s1154_s23, %s1155_s9  }
 0x286 PF: > { %s722_s10 = sand.u32 1, %s1129_s15   ;;  %p1592_p7 = scmp.ge.s32.totalorder %s1141_s18, 2 }
 0x287   : > { %s723_s13 = scalar_lea.sflag [#allocation4], %s722_s10 }
 0x288   : > { %p892_p10 = pnand %p1592_p7, %p1280_p12 }
 0x28a   : > { %p893_p13 = pneg %p892_p10 }
 0x28c   : > { %1124 = dma.done.wait (%p893_p13), %s723_s13, 256  }
 0x28d   : > { %1126 = vsyncadd (%p893_p13), %s723_s13, 4294967040  ;;  %p18_p8 = scmp.ge.s32.totalorder %s1202_s19, 4   ;;  %s1593_s15 = smov %s1133_s16 }
 0x28e   : > { %s1594_s16 = smov %s1137_s17  ;;  %s1595_s17 = smov %s1211_s22 }
 0x28f   : > { %s1596_s18 = smov %s1202_s19  ;;  %20 = sbr.rel (!%p18_p8) target bundleno = 6 (0x6), region = 96 }
 0x294   :  { %729 = vsyncpa [#allocation3], 1 }
 0x295   :  { %731 = vsyncpa [#allocation3 + $0x1], 1 }
 0x296   :  { %732 = vsyncpa [#allocation6], 1 }
 0x297   :  { %733 = vsyncpa [#allocation4], 1 }
 0x298   :  { %735 = vsyncpa [#allocation4 + $0x1], 1 }

</bundles_post_ra>
